<compile_context>
chip_gen: v6e
topology: v6e:2x2x1
jax: 0.10.0
libtpu: 0.0.40
codegen_flags: <defaults>
</compile_context>

<pallas_src>
import functools

import jax
import jax.numpy as jnp
from jax.experimental import pallas as pl
from jax.experimental.pallas import tpu as pltpu

_BN_EPS = 1e-5


# ------------------------------- the kernel --------------------------------

def _prelu(y, alpha):
    return jnp.where(y >= 0.0, y, alpha * y)


def _rdb_kernel(x_ref,
                w1_ref, b1_ref,
                w2_ref, b2_ref,
                w3_ref, b3_ref,
                *rest,
                H, W, Cin, C, identity_residual):
    # Per grid step (one image); slab lane layout is (w, c) with c minor:
    #   x_ref   : (1, H, W*Cin)        input row slab (f32)
    #   w1_ref  : (3, W*Cin, W*C)      dy-sliced banded conv1 weight (bf16,
    #                                  BN scale folded, edge-clipped columns)
    #   w2_ref  : (3, W*C, W*C)        banded conv2 weight (+ channel shuffle)
    #   w3_ref  : (W*C, W*C)           block-diag 1x1 conv3 (bf16)
    #   wd_ref  : (W*Cin, W*C)         block-diag 1x1 downsample (bf16), only
    #                                  when in_ch != out_ch
    #   b*_ref  : (1, W*C)             folded per-channel biases (f32, tiled)
    #   alpha   : (1, 1) SMEM scalar   shared PReLU slope
    #   out_ref : (1, H, W*C)          lane-dense output slab
    if identity_residual:
        alpha_ref, out_ref, xpad_ref, hpad_ref = rest
        wd_ref = bd_ref = None
    else:
        wd_ref, bd_ref, alpha_ref, out_ref, xpad_ref, hpad_ref = rest

    alpha = alpha_ref[0, 0]
    bf16 = jnp.bfloat16
    f32 = jnp.float32

    # ---------------- conv1 (3x3) + bn1 + PReLU ----------------------------
    # Row-halo only (column halo folded away by edge-clipped bands).  Halo
    # rows are re-zeroed every step: scratch is per-core and uninitialized,
    # and with a "parallel" grid not every core sees program_id == 0.
    xpad_ref[0:1, :] = jnp.zeros((1, W * Cin), xpad_ref.dtype)
    xpad_ref[H + 1:H + 2, :] = jnp.zeros((1, W * Cin), xpad_ref.dtype)
    xpad_ref[1:H + 1, :] = x_ref[0]                       # lane-0 aligned store

    # Three dy-sliced accumulating matmuls (bf16 operands, f32 accumulation).
    h1 = (jnp.dot(xpad_ref[0:H, :].astype(bf16), w1_ref[0],
                  preferred_element_type=f32) +
          jnp.dot(xpad_ref[1:H + 1, :].astype(bf16), w1_ref[1],
                  preferred_element_type=f32) +
          jnp.dot(xpad_ref[2:H + 2, :].astype(bf16), w1_ref[2],
                  preferred_element_type=f32))
    h1 = _prelu(h1 + b1_ref[...], alpha)                  # (H, W*C) f32

    # -------- conv2 (3x3) + bn2 + PReLU; channel_shuffle folded in w2 -------
    hpad_ref[0:1, :] = jnp.zeros((1, W * C), hpad_ref.dtype)
    hpad_ref[H + 1:H + 2, :] = jnp.zeros((1, W * C), hpad_ref.dtype)
    hpad_ref[1:H + 1, :] = h1                             # 128-lane aligned

    h2 = (jnp.dot(hpad_ref[0:H, :].astype(bf16), w2_ref[0],
                  preferred_element_type=f32) +
          jnp.dot(hpad_ref[1:H + 1, :].astype(bf16), w2_ref[1],
                  preferred_element_type=f32) +
          jnp.dot(hpad_ref[2:H + 2, :].astype(bf16), w2_ref[2],
                  preferred_element_type=f32))
    h2 = _prelu(h2 + b2_ref[...], alpha)                  # (H, W*C) f32

    # ---------------- conv3 (1x1) + bn3 -------------------------------------
    y = jnp.dot(h2.astype(bf16), w3_ref[...],
                preferred_element_type=f32) + b3_ref[...]

    # ------ residual: identity, or 1x1 downsample + bn (in_ch != out_ch) ----
    if identity_residual:
        res = x_ref[0]
    else:
        res = jnp.dot(x_ref[0].astype(bf16), wd_ref[...],
                      preferred_element_type=f32) + bd_ref[...]

    # ---------------- add + final PReLU, lane-dense store -------------------
    out_ref[0] = _prelu(y + res, alpha).astype(out_ref.dtype)


# --------------------------- parameter folding ------------------------------

def fold_bn(gamma, beta, mean, var, conv_bias=None):
    """Fold eval-mode BatchNorm (+ optional conv bias) into (scale, bias)."""
    scale = gamma / jnp.sqrt(var + _BN_EPS)
    b = jnp.zeros_like(mean) if conv_bias is None else conv_bias
    return scale, scale * (b - mean) + beta


def _tile_per_channel(v, W):
    # (C,) -> (1, W*C): lane index w*C + c holds v[c].
    return jnp.tile(v.reshape(1, -1), (1, W))


def _band_weight_3x3(w9, scale, W):
    """(9, Cin, Cout) taps + per-Cout BN scale -> (3, W*Cin, W*Cout) bands.

    Band dy acts on the dy-shifted row of the (row-)padded W*Cin slab; the dx
    shifts and channel mixing are encoded in the band, and out-of-range dx
    taps are simply clipped (no column halo needed).  BN scale is folded into
    the output columns (all in f32; cast to bf16 by the caller).
    """
    w9 = (w9 * scale).reshape(3, 3, *w9.shape[1:])        # (dy, dx, Cin, Cout)
    Cin, Cout = w9.shape[2], w9.shape[3]
    sel = jnp.zeros((3, W, W), w9.dtype)                  # sel[dx, j, w]
    for dx in range(3):                                   # j = w + dx - 1
        lo, hi = max(0, 1 - dx), min(W, W + 1 - dx)
        idx_w = jnp.arange(lo, hi)
        sel = sel.at[dx, idx_w + dx - 1, idx_w].set(1.0)
    band = jnp.einsum("xjw,yxio->yjiwo", sel, w9)         # (dy, j, Cin, w, Cout)
    return band.reshape(3, W * Cin, W * Cout)


def _block_diag_1x1(w, scale, W):
    """(Cin, Cout) 1x1 conv + per-Cout scale -> (W*Cin, W*Cout) block-diag."""
    w = w * scale
    Cin, Cout = w.shape
    eye = jnp.eye(W, dtype=w.dtype)
    big = jnp.einsum("io,wv->wivo", w, eye)
    return big.reshape(W * Cin, W * Cout)


def prepare_kernel_params(raw, W):
    """Fold BN / conv bias / channel_shuffle into static kernel weights."""
    out_ch = raw["w3"].shape[-1]
    g, cpg = 2, out_ch // 2

    s1, b1 = fold_bn(*raw["bn1"], conv_bias=raw["cb1"])
    s2, b2 = fold_bn(*raw["bn2"], conv_bias=raw["cb2"])
    s3, b3 = fold_bn(*raw["bn3"], conv_bias=raw["cb3"])

    # channel_shuffle(groups=2) folded into conv2's input channels:
    #   conv2(shuffle(h)) == conv2_folded(h),
    #   w2_folded[:, c, :] = w2[:, (c % cpg)*g + c // cpg, :]
    perm = jnp.array([(c % cpg) * g + c // cpg for c in range(out_ch)])
    w2_folded = raw["w2"][:, perm, :]

    kp = dict(
        w1=_band_weight_3x3(raw["w1"], s1, W).astype(jnp.bfloat16),
        b1=_tile_per_channel(b1, W),
        w2=_band_weight_3x3(w2_folded, s2, W).astype(jnp.bfloat16),
        b2=_tile_per_channel(b2, W),
        w3=_block_diag_1x1(raw["w3"], s3, W).astype(jnp.bfloat16),
        b3=_tile_per_channel(b3, W),
        alpha=raw["alpha"],
    )
    if raw["wd"] is not None:
        sd, bd = fold_bn(*raw["bnd"], conv_bias=None)
        kp["wd"] = _block_diag_1x1(raw["wd"], sd, W).astype(jnp.bfloat16)
        kp["bd"] = _tile_per_channel(bd, W)
    # in_ch == out_ch: no "wd"/"bd" keys -> identity residual, no dead weight.
    return kp


# ------------------------------ forward pass --------------------------------

def rdb_forward(x_nchw, kp):
    """x_nchw: (N, Cin, H, W) float32; kp: prepare_kernel_params(...) output."""
    N, Cin, H, W = x_nchw.shape
    C = kp["w3"].shape[-1] // W
    identity_residual = "wd" not in kp   # static (pytree structure)

    # NCHW -> lane-dense row slabs (N, H, W*Cin), channels minor within a
    # column.  When chaining RDBs, keep this layout between blocks instead.
    x_slab = jnp.transpose(x_nchw, (0, 2, 3, 1)).reshape(N, H, W * Cin)

    kernel = functools.partial(_rdb_kernel, H=H, W=W, Cin=Cin, C=C,
                               identity_residual=identity_residual)

    def full_spec(a):  # whole (small) parameter array, same block every step
        return pl.BlockSpec(a.shape, lambda n: (0,) * a.ndim)

    in_specs = [
        pl.BlockSpec((1, H, W * Cin), lambda n: (n, 0, 0)),
        full_spec(kp["w1"]), full_spec(kp["b1"]),
        full_spec(kp["w2"]), full_spec(kp["b2"]),
        full_spec(kp["w3"]), full_spec(kp["b3"]),
    ]
    args = [x_slab,
            kp["w1"], kp["b1"], kp["w2"], kp["b2"], kp["w3"], kp["b3"]]
    if not identity_residual:
        in_specs += [full_spec(kp["wd"]), full_spec(kp["bd"])]
        args += [kp["wd"], kp["bd"]]
    in_specs.append(pl.BlockSpec(memory_space=pltpu.MemorySpace.SMEM))  # alpha
    args.append(kp["alpha"])

    grid_spec = pltpu.PrefetchScalarGridSpec(
        num_scalar_prefetch=0,
        grid=(N,),
        in_specs=in_specs,
        out_specs=pl.BlockSpec((1, H, W * C), lambda n: (n, 0, 0)),
        scratch_shapes=[
            pltpu.VMEM((H + 2, W * Cin), jnp.float32),   # row-padded x slab
            pltpu.VMEM((H + 2, W * C), jnp.float32),     # row-padded h1 slab
        ],
    )

    out = pl.pallas_call(
        kernel,
        out_shape=jax.ShapeDtypeStruct((N, H, W * C), x_nchw.dtype),
        grid_spec=grid_spec,
        compiler_params=pltpu.CompilerParams(
            dimension_semantics=("parallel",),
            vmem_limit_bytes=32 * 1024 * 1024),
    )(*args)

    # (N, H, W*C) -> NCHW to mirror the PyTorch output layout.
    return jnp.transpose(out.reshape(N, H, W, C), (0, 3, 1, 2))


# ------------------------------ test parameters -----------------------------

def make_params(key, in_ch, out_ch):
    """Random parameters in a PyTorch-like layout.

    3x3 conv weights are (9, Cin, Cout) with tap k = 3*dy + dx, i.e.
    w[k, ci, co] == torch_conv.weight[co, ci, k // 3, k % 3]; 1x1 weights are
    (Cin, Cout).  BN tuples are (gamma, beta, running_mean, running_var).
    """
    ks = iter(jax.random.split(key, 32))

    def bn(c):
        gamma = 1.0 + 0.1 * jax.random.normal(next(ks), (c,), jnp.float32)
        beta = 0.1 * jax.random.normal(next(ks), (c,), jnp.float32)
        mean = 0.1 * jax.random.normal(next(ks), (c,), jnp.float32)
        var = jnp.abs(1.0 + 0.1 * jax.random.normal(next(ks), (c,), jnp.float32))
        return gamma, beta, mean, var

    p = dict(
        w1=0.1 * jax.random.normal(next(ks), (9, in_ch, out_ch), jnp.float32),
        cb1=0.1 * jax.random.normal(next(ks), (out_ch,), jnp.float32),
        bn1=bn(out_ch),
        w2=0.1 * jax.random.normal(next(ks), (9, out_ch, out_ch), jnp.float32),
        cb2=0.1 * jax.random.normal(next(ks), (out_ch,), jnp.float32),
        bn2=bn(out_ch),
        w3=0.1 * jax.random.normal(next(ks), (out_ch, out_ch), jnp.float32),
        cb3=0.1 * jax.random.normal(next(ks), (out_ch,), jnp.float32),
        bn3=bn(out_ch),
        alpha=jnp.full((1, 1), 0.25, jnp.float32),   # nn.PReLU() default, shared
    )
    if in_ch != out_ch:
        p["wd"] = 0.1 * jax.random.normal(next(ks), (in_ch, out_ch), jnp.float32)
        p["bnd"] = bn(out_ch)
    else:
        p["wd"], p["bnd"] = None, None
    return p


# ----------------------------------- main ------------------------------------

if __name__ == "__main__":
    key = jax.random.PRNGKey(0)
    k_x, k_p = jax.random.split(key)

    N, in_ch, out_ch, H, W = 2, 4, 8, 16, 16
    x = jax.random.normal(k_x, (N, in_ch, H, W), jnp.float32)   # NCHW like PyTorch

    raw = make_params(k_p, in_ch, out_ch)
    kparams = prepare_kernel_params(raw, W=W)

    fwd = jax.jit(rdb_forward)
    out = fwd(x, kparams)
    jax.block_until_ready(out)
    assert out.shape == (N, out_ch, H, W)
    print("KERNEL_OK")
</pallas_src>

<mosaic_0001>
module attributes {stable_mosaic.version = 11 : i64} {
  func.func @_rdb_kernel(%arg0: i32, %arg1: memref<1x16x64xf32, #tpu.memory_space<vmem>>, %arg2: memref<3x64x128xbf16, #tpu.memory_space<vmem>>, %arg3: memref<1x128xf32, #tpu.memory_space<vmem>>, %arg4: memref<3x128x128xbf16, #tpu.memory_space<vmem>>, %arg5: memref<1x128xf32, #tpu.memory_space<vmem>>, %arg6: memref<128x128xbf16, #tpu.memory_space<vmem>>, %arg7: memref<1x128xf32, #tpu.memory_space<vmem>>, %arg8: memref<64x128xbf16, #tpu.memory_space<vmem>>, %arg9: memref<1x128xf32, #tpu.memory_space<vmem>>, %arg10: memref<1x1xf32, #tpu.memory_space<smem>>, %arg11: memref<1x16x128xf32, #tpu.memory_space<vmem>>, %arg12: memref<18x64xf32, #tpu.memory_space<vmem>>, %arg13: memref<18x128xf32, #tpu.memory_space<vmem>>) attributes {dimension_semantics = [#tpu.dimension_semantics<parallel>], iteration_bounds = array<i64: 2>, scalar_prefetch = 0 : i64, scratch_operands = 2 : i64, tpu.core_type = #tpu.core_type<tc>, window_params = [{transform_indices = @transform_0, window_bounds = array<i64: 1, 16, 64>}, {pipeline_mode = #tpu.pipeline_mode<synchronous>, transform_indices = @transform_1, window_bounds = array<i64: 3, 64, 128>}, {pipeline_mode = #tpu.pipeline_mode<synchronous>, transform_indices = @transform_2, window_bounds = array<i64: 1, 128>}, {pipeline_mode = #tpu.pipeline_mode<synchronous>, transform_indices = @transform_3, window_bounds = array<i64: 3, 128, 128>}, {pipeline_mode = #tpu.pipeline_mode<synchronous>, transform_indices = @transform_4, window_bounds = array<i64: 1, 128>}, {pipeline_mode = #tpu.pipeline_mode<synchronous>, transform_indices = @transform_5, window_bounds = array<i64: 128, 128>}, {pipeline_mode = #tpu.pipeline_mode<synchronous>, transform_indices = @transform_6, window_bounds = array<i64: 1, 128>}, {pipeline_mode = #tpu.pipeline_mode<synchronous>, transform_indices = @transform_7, window_bounds = array<i64: 64, 128>}, {pipeline_mode = #tpu.pipeline_mode<synchronous>, transform_indices = @transform_8, window_bounds = array<i64: 1, 128>}, {transform_indices = @transform_9, window_bounds = array<i64: 1, 1>}, {transform_indices = @transform_10, window_bounds = array<i64: 1, 16, 128>}]} {
    %c0 = arith.constant 0 : index
    %c0_0 = arith.constant 0 : index
    %0 = memref.load %arg10[%c0, %c0_0] : memref<1x1xf32, #tpu.memory_space<smem>>
    %cst = arith.constant 0.000000e+00 : f32
    %1 = vector.broadcast %cst : f32 to vector<1x64xf32>
    %c0_1 = arith.constant 0 : index
    %c0_2 = arith.constant 0 : index
    %2 = vector.load %arg12[%c0_1, %c0_2] : memref<18x64xf32, #tpu.memory_space<vmem>>, vector<1x64xf32>
    tpu.vector_store %arg12[%c0_1, %c0_2], %1 {strides = array<i32>} : memref<18x64xf32, #tpu.memory_space<vmem>>, vector<1x64xf32>,
    %cst_3 = arith.constant 0.000000e+00 : f32
    %3 = vector.broadcast %cst_3 : f32 to vector<1x64xf32>
    %c17 = arith.constant 17 : index
    %c0_4 = arith.constant 0 : index
    %4 = vector.load %arg12[%c17, %c0_4] : memref<18x64xf32, #tpu.memory_space<vmem>>, vector<1x64xf32>
    tpu.vector_store %arg12[%c17, %c0_4], %3 {strides = array<i32>} : memref<18x64xf32, #tpu.memory_space<vmem>>, vector<1x64xf32>,
    %c0_5 = arith.constant 0 : index
    %c0_6 = arith.constant 0 : index
    %c0_7 = arith.constant 0 : index
    %5 = vector.load %arg1[%c0_5, %c0_6, %c0_7] : memref<1x16x64xf32, #tpu.memory_space<vmem>>, vector<1x16x64xf32>
    %6 = vector.shape_cast %5 : vector<1x16x64xf32> to vector<16x64xf32>
    %c1 = arith.constant 1 : index
    %c0_8 = arith.constant 0 : index
    %7 = vector.load %arg12[%c1, %c0_8] : memref<18x64xf32, #tpu.memory_space<vmem>>, vector<16x64xf32>
    tpu.vector_store %arg12[%c1, %c0_8], %6 {strides = array<i32>} : memref<18x64xf32, #tpu.memory_space<vmem>>, vector<16x64xf32>,
    %c0_9 = arith.constant 0 : index
    %c0_10 = arith.constant 0 : index
    %8 = vector.load %arg12[%c0_9, %c0_10] : memref<18x64xf32, #tpu.memory_space<vmem>>, vector<16x64xf32>
    %9 = arith.truncf %8 : vector<16x64xf32> to vector<16x64xbf16>
    %c0_11 = arith.constant 0 : index
    %c0_12 = arith.constant 0 : index
    %c0_13 = arith.constant 0 : index
    %10 = vector.load %arg2[%c0_11, %c0_12, %c0_13] : memref<3x64x128xbf16, #tpu.memory_space<vmem>>, vector<1x64x128xbf16>
    %11 = vector.shape_cast %10 : vector<1x64x128xbf16> to vector<64x128xbf16>
    %cst_14 = arith.constant dense<0.000000e+00> : vector<16x128xf32>
    %12 = tpu.matmul %9, %11, %cst_14 {dimension_numbers = #tpu.dot_dimension_numbers<[1], [0], [0], [1], [0, 0, 1, 1], [], []>} : vector<16x64xbf16>, vector<64x128xbf16>, vector<16x128xf32> -> vector<16x128xf32>
    %c1_15 = arith.constant 1 : index
    %c0_16 = arith.constant 0 : index
    %13 = vector.load %arg12[%c1_15, %c0_16] : memref<18x64xf32, #tpu.memory_space<vmem>>, vector<16x64xf32>
    %14 = arith.truncf %13 : vector<16x64xf32> to vector<16x64xbf16>
    %c1_17 = arith.constant 1 : index
    %c0_18 = arith.constant 0 : index
    %c0_19 = arith.constant 0 : index
    %15 = vector.load %arg2[%c1_17, %c0_18, %c0_19] : memref<3x64x128xbf16, #tpu.memory_space<vmem>>, vector<1x64x128xbf16>
    %16 = vector.shape_cast %15 : vector<1x64x128xbf16> to vector<64x128xbf16>
    %cst_20 = arith.constant dense<0.000000e+00> : vector<16x128xf32>
    %17 = tpu.matmul %14, %16, %cst_20 {dimension_numbers = #tpu.dot_dimension_numbers<[1], [0], [0], [1], [0, 0, 1, 1], [], []>} : vector<16x64xbf16>, vector<64x128xbf16>, vector<16x128xf32> -> vector<16x128xf32>
    %18 = arith.addf %12, %17 : vector<16x128xf32>
    %c2 = arith.constant 2 : index
    %c0_21 = arith.constant 0 : index
    %19 = vector.load %arg12[%c2, %c0_21] : memref<18x64xf32, #tpu.memory_space<vmem>>, vector<16x64xf32>
    %20 = arith.truncf %19 : vector<16x64xf32> to vector<16x64xbf16>
    %c2_22 = arith.constant 2 : index
    %c0_23 = arith.constant 0 : index
    %c0_24 = arith.constant 0 : index
    %21 = vector.load %arg2[%c2_22, %c0_23, %c0_24] : memref<3x64x128xbf16, #tpu.memory_space<vmem>>, vector<1x64x128xbf16>
    %22 = vector.shape_cast %21 : vector<1x64x128xbf16> to vector<64x128xbf16>
    %cst_25 = arith.constant dense<0.000000e+00> : vector<16x128xf32>
    %23 = tpu.matmul %20, %22, %cst_25 {dimension_numbers = #tpu.dot_dimension_numbers<[1], [0], [0], [1], [0, 0, 1, 1], [], []>} : vector<16x64xbf16>, vector<64x128xbf16>, vector<16x128xf32> -> vector<16x128xf32>
    %24 = arith.addf %18, %23 : vector<16x128xf32>
    %c0_26 = arith.constant 0 : index
    %c0_27 = arith.constant 0 : index
    %25 = vector.load %arg3[%c0_26, %c0_27] : memref<1x128xf32, #tpu.memory_space<vmem>>, vector<1x128xf32>
    %26 = vector.broadcast %25 : vector<1x128xf32> to vector<16x128xf32>
    %27 = arith.addf %24, %26 : vector<16x128xf32>
    %cst_28 = arith.constant 0.000000e+00 : f32
    %28 = vector.broadcast %cst_28 : f32 to vector<16x128xf32>
    %29 = arith.cmpf oge, %27, %28 : vector<16x128xf32>
    %30 = vector.broadcast %0 : f32 to vector<16x128xf32>
    %31 = arith.mulf %30, %27 : vector<16x128xf32>
    %32 = arith.select %29, %27, %31 : vector<16x128xi1>, vector<16x128xf32>
    %cst_29 = arith.constant 0.000000e+00 : f32
    %33 = vector.broadcast %cst_29 : f32 to vector<1x128xf32>
    %c0_30 = arith.constant 0 : index
    %c0_31 = arith.constant 0 : index
    %34 = vector.load %arg13[%c0_30, %c0_31] : memref<18x128xf32, #tpu.memory_space<vmem>>, vector<1x128xf32>
    tpu.vector_store %arg13[%c0_30, %c0_31], %33 {strides = array<i32>} : memref<18x128xf32, #tpu.memory_space<vmem>>, vector<1x128xf32>,
    %cst_32 = arith.constant 0.000000e+00 : f32
    %35 = vector.broadcast %cst_32 : f32 to vector<1x128xf32>
    %c17_33 = arith.constant 17 : index
    %c0_34 = arith.constant 0 : index
    %36 = vector.load %arg13[%c17_33, %c0_34] : memref<18x128xf32, #tpu.memory_space<vmem>>, vector<1x128xf32>
    tpu.vector_store %arg13[%c17_33, %c0_34], %35 {strides = array<i32>} : memref<18x128xf32, #tpu.memory_space<vmem>>, vector<1x128xf32>,
    %c1_35 = arith.constant 1 : index
    %c0_36 = arith.constant 0 : index
    %37 = vector.load %arg13[%c1_35, %c0_36] : memref<18x128xf32, #tpu.memory_space<vmem>>, vector<16x128xf32>
    tpu.vector_store %arg13[%c1_35, %c0_36], %32 {strides = array<i32>} : memref<18x128xf32, #tpu.memory_space<vmem>>, vector<16x128xf32>,
    %c0_37 = arith.constant 0 : index
    %c0_38 = arith.constant 0 : index
    %38 = vector.load %arg13[%c0_37, %c0_38] : memref<18x128xf32, #tpu.memory_space<vmem>>, vector<16x128xf32>
    %39 = arith.truncf %38 : vector<16x128xf32> to vector<16x128xbf16>
    %c0_39 = arith.constant 0 : index
    %c0_40 = arith.constant 0 : index
    %c0_41 = arith.constant 0 : index
    %40 = vector.load %arg4[%c0_39, %c0_40, %c0_41] : memref<3x128x128xbf16, #tpu.memory_space<vmem>>, vector<1x128x128xbf16>
    %41 = vector.shape_cast %40 : vector<1x128x128xbf16> to vector<128x128xbf16>
    %cst_42 = arith.constant dense<0.000000e+00> : vector<16x128xf32>
    %42 = tpu.matmul %39, %41, %cst_42 {dimension_numbers = #tpu.dot_dimension_numbers<[1], [0], [0], [1], [0, 0, 1, 1], [], []>} : vector<16x128xbf16>, vector<128x128xbf16>, vector<16x128xf32> -> vector<16x128xf32>
    %c1_43 = arith.constant 1 : index
    %c0_44 = arith.constant 0 : index
    %43 = vector.load %arg13[%c1_43, %c0_44] : memref<18x128xf32, #tpu.memory_space<vmem>>, vector<16x128xf32>
    %44 = arith.truncf %43 : vector<16x128xf32> to vector<16x128xbf16>
    %c1_45 = arith.constant 1 : index
    %c0_46 = arith.constant 0 : index
    %c0_47 = arith.constant 0 : index
    %45 = vector.load %arg4[%c1_45, %c0_46, %c0_47] : memref<3x128x128xbf16, #tpu.memory_space<vmem>>, vector<1x128x128xbf16>
    %46 = vector.shape_cast %45 : vector<1x128x128xbf16> to vector<128x128xbf16>
    %cst_48 = arith.constant dense<0.000000e+00> : vector<16x128xf32>
    %47 = tpu.matmul %44, %46, %cst_48 {dimension_numbers = #tpu.dot_dimension_numbers<[1], [0], [0], [1], [0, 0, 1, 1], [], []>} : vector<16x128xbf16>, vector<128x128xbf16>, vector<16x128xf32> -> vector<16x128xf32>
    %48 = arith.addf %42, %47 : vector<16x128xf32>
    %c2_49 = arith.constant 2 : index
    %c0_50 = arith.constant 0 : index
    %49 = vector.load %arg13[%c2_49, %c0_50] : memref<18x128xf32, #tpu.memory_space<vmem>>, vector<16x128xf32>
    %50 = arith.truncf %49 : vector<16x128xf32> to vector<16x128xbf16>
    %c2_51 = arith.constant 2 : index
    %c0_52 = arith.constant 0 : index
    %c0_53 = arith.constant 0 : index
    %51 = vector.load %arg4[%c2_51, %c0_52, %c0_53] : memref<3x128x128xbf16, #tpu.memory_space<vmem>>, vector<1x128x128xbf16>
    %52 = vector.shape_cast %51 : vector<1x128x128xbf16> to vector<128x128xbf16>
    %cst_54 = arith.constant dense<0.000000e+00> : vector<16x128xf32>
    %53 = tpu.matmul %50, %52, %cst_54 {dimension_numbers = #tpu.dot_dimension_numbers<[1], [0], [0], [1], [0, 0, 1, 1], [], []>} : vector<16x128xbf16>, vector<128x128xbf16>, vector<16x128xf32> -> vector<16x128xf32>
    %54 = arith.addf %48, %53 : vector<16x128xf32>
    %c0_55 = arith.constant 0 : index
    %c0_56 = arith.constant 0 : index
    %55 = vector.load %arg5[%c0_55, %c0_56] : memref<1x128xf32, #tpu.memory_space<vmem>>, vector<1x128xf32>
    %56 = vector.broadcast %55 : vector<1x128xf32> to vector<16x128xf32>
    %57 = arith.addf %54, %56 : vector<16x128xf32>
    %cst_57 = arith.constant 0.000000e+00 : f32
    %58 = vector.broadcast %cst_57 : f32 to vector<16x128xf32>
    %59 = arith.cmpf oge, %57, %58 : vector<16x128xf32>
    %60 = vector.broadcast %0 : f32 to vector<16x128xf32>
    %61 = arith.mulf %60, %57 : vector<16x128xf32>
    %62 = arith.select %59, %57, %61 : vector<16x128xi1>, vector<16x128xf32>
    %63 = arith.truncf %62 : vector<16x128xf32> to vector<16x128xbf16>
    %c0_58 = arith.constant 0 : index
    %c0_59 = arith.constant 0 : index
    %64 = vector.load %arg6[%c0_58, %c0_59] : memref<128x128xbf16, #tpu.memory_space<vmem>>, vector<128x128xbf16>
    %cst_60 = arith.constant dense<0.000000e+00> : vector<16x128xf32>
    %65 = tpu.matmul %63, %64, %cst_60 {dimension_numbers = #tpu.dot_dimension_numbers<[1], [0], [0], [1], [0, 0, 1, 1], [], []>} : vector<16x128xbf16>, vector<128x128xbf16>, vector<16x128xf32> -> vector<16x128xf32>
    %c0_61 = arith.constant 0 : index
    %c0_62 = arith.constant 0 : index
    %66 = vector.load %arg7[%c0_61, %c0_62] : memref<1x128xf32, #tpu.memory_space<vmem>>, vector<1x128xf32>
    %67 = vector.broadcast %66 : vector<1x128xf32> to vector<16x128xf32>
    %68 = arith.addf %65, %67 : vector<16x128xf32>
    %c0_63 = arith.constant 0 : index
    %c0_64 = arith.constant 0 : index
    %c0_65 = arith.constant 0 : index
    %69 = vector.load %arg1[%c0_63, %c0_64, %c0_65] : memref<1x16x64xf32, #tpu.memory_space<vmem>>, vector<1x16x64xf32>
    %70 = vector.shape_cast %69 : vector<1x16x64xf32> to vector<16x64xf32>
    %71 = arith.truncf %70 : vector<16x64xf32> to vector<16x64xbf16>
    %c0_66 = arith.constant 0 : index
    %c0_67 = arith.constant 0 : index
    %72 = vector.load %arg8[%c0_66, %c0_67] : memref<64x128xbf16, #tpu.memory_space<vmem>>, vector<64x128xbf16>
    %cst_68 = arith.constant dense<0.000000e+00> : vector<16x128xf32>
    %73 = tpu.matmul %71, %72, %cst_68 {dimension_numbers = #tpu.dot_dimension_numbers<[1], [0], [0], [1], [0, 0, 1, 1], [], []>} : vector<16x64xbf16>, vector<64x128xbf16>, vector<16x128xf32> -> vector<16x128xf32>
    %c0_69 = arith.constant 0 : index
    %c0_70 = arith.constant 0 : index
    %74 = vector.load %arg9[%c0_69, %c0_70] : memref<1x128xf32, #tpu.memory_space<vmem>>, vector<1x128xf32>
    %75 = vector.broadcast %74 : vector<1x128xf32> to vector<16x128xf32>
    %76 = arith.addf %73, %75 : vector<16x128xf32>
    %77 = arith.addf %68, %76 : vector<16x128xf32>
    %cst_71 = arith.constant 0.000000e+00 : f32
    %78 = vector.broadcast %cst_71 : f32 to vector<16x128xf32>
    %79 = arith.cmpf oge, %77, %78 : vector<16x128xf32>
    %80 = vector.broadcast %0 : f32 to vector<16x128xf32>
    %81 = arith.mulf %80, %77 : vector<16x128xf32>
    %82 = arith.select %79, %77, %81 : vector<16x128xi1>, vector<16x128xf32>
    %c0_72 = arith.constant 0 : index
    %c0_73 = arith.constant 0 : index
    %c0_74 = arith.constant 0 : index
    %83 = vector.load %arg11[%c0_72, %c0_73, %c0_74] : memref<1x16x128xf32, #tpu.memory_space<vmem>>, vector<1x16x128xf32>
    %84 = vector.shape_cast %83 : vector<1x16x128xf32> to vector<16x128xf32>
    %85 = vector.shape_cast %82 : vector<16x128xf32> to vector<1x16x128xf32>
    tpu.vector_store %arg11[%c0_72, %c0_73, %c0_74], %85 {strides = array<i32>} : memref<1x16x128xf32, #tpu.memory_space<vmem>>, vector<1x16x128xf32>,
    return
  }
  func.func @transform_0(%arg0: i32) -> (i32, i32, i32) {
    %c0_i32 = arith.constant 0 : i32
    %c0_i32_0 = arith.constant 0 : i32
    %c0_i32_1 = arith.constant 0 : i32
    return %arg0, %c0_i32, %c0_i32_0 : i32, i32, i32
  }
  func.func @transform_1(%arg0: i32) -> (i32, i32, i32) {
    %c0_i32 = arith.constant 0 : i32
    %c0_i32_0 = arith.constant 0 : i32
    %c0_i32_1 = arith.constant 0 : i32
    %c0_i32_2 = arith.constant 0 : i32
    return %c0_i32, %c0_i32_0, %c0_i32_1 : i32, i32, i32
  }
  func.func @transform_2(%arg0: i32) -> (i32, i32) {
    %c0_i32 = arith.constant 0 : i32
    %c0_i32_0 = arith.constant 0 : i32
    %c0_i32_1 = arith.constant 0 : i32
    return %c0_i32, %c0_i32_0 : i32, i32
  }
  func.func @transform_3(%arg0: i32) -> (i32, i32, i32) {
    %c0_i32 = arith.constant 0 : i32
    %c0_i32_0 = arith.constant 0 : i32
    %c0_i32_1 = arith.constant 0 : i32
    %c0_i32_2 = arith.constant 0 : i32
    return %c0_i32, %c0_i32_0, %c0_i32_1 : i32, i32, i32
  }
  func.func @transform_4(%arg0: i32) -> (i32, i32) {
    %c0_i32 = arith.constant 0 : i32
    %c0_i32_0 = arith.constant 0 : i32
    %c0_i32_1 = arith.constant 0 : i32
    return %c0_i32, %c0_i32_0 : i32, i32
  }
  func.func @transform_5(%arg0: i32) -> (i32, i32) {
    %c0_i32 = arith.constant 0 : i32
    %c0_i32_0 = arith.constant 0 : i32
    %c0_i32_1 = arith.constant 0 : i32
    return %c0_i32, %c0_i32_0 : i32, i32
  }
  func.func @transform_6(%arg0: i32) -> (i32, i32) {
    %c0_i32 = arith.constant 0 : i32
    %c0_i32_0 = arith.constant 0 : i32
    %c0_i32_1 = arith.constant 0 : i32
    return %c0_i32, %c0_i32_0 : i32, i32
  }
  func.func @transform_7(%arg0: i32) -> (i32, i32) {
    %c0_i32 = arith.constant 0 : i32
    %c0_i32_0 = arith.constant 0 : i32
    %c0_i32_1 = arith.constant 0 : i32
    return %c0_i32, %c0_i32_0 : i32, i32
  }
  func.func @transform_8(%arg0: i32) -> (i32, i32) {
    %c0_i32 = arith.constant 0 : i32
    %c0_i32_0 = arith.constant 0 : i32
    %c0_i32_1 = arith.constant 0 : i32
    return %c0_i32, %c0_i32_0 : i32, i32
  }
  func.func @transform_9(%arg0: i32) -> (i32, i32) {
    %c0_i32 = arith.constant 0 : i32
    %c0_i32_0 = arith.constant 0 : i32
    %c0_i32_1 = arith.constant 0 : i32
    return %c0_i32, %c0_i32_0 : i32, i32
  }
  func.func @transform_10(%arg0: i32) -> (i32, i32, i32) {
    %c0_i32 = arith.constant 0 : i32
    %c0_i32_0 = arith.constant 0 : i32
    %c0_i32_1 = arith.constant 0 : i32
    return %arg0, %c0_i32, %c0_i32_0 : i32, i32, i32
  }
}

</mosaic_0001>

<bundles_post_ra>
// kernel: rdb_forward.1
= control target key start
LH: loop header
LB: loop body
LE: loop exit
PB: predicated region body
PF: predicated region fallthrough
CT: control target
= control target key end

     0   :  { %s1666_s15 = smov 0   ;;  %s1936_s0 = inlined_call_operand.vmem [shape: f32[2,16,64], index: 0, kind: input, shape index: {}]   ;;  %s1937_s1 = inlined_call_operand.vmem [shape: bf16[3,64,128], index: 1, kind: input, shape index: {}]   ;;  %s1938_s2 = inlined_call_operand.vmem [shape: f32[1,128], index: 2, kind: input, shape index: {}]   ;;  %s1939_s3 = inlined_call_operand.vmem [shape: bf16[3,128,128], index: 3, kind: input, shape index: {}]   ;;  %s1940_s4 = inlined_call_operand.vmem [shape: f32[1,128], index: 4, kind: input, shape index: {}]   ;;  %s1941_s5 = inlined_call_operand.vmem [shape: bf16[128,128], index: 5, kind: input, shape index: {}]   ;;  %s1942_s6 = inlined_call_operand.vmem [shape: f32[1,128], index: 6, kind: input, shape index: {}]   ;;  %s1943_s7 = inlined_call_operand.vmem [shape: bf16[64,128], index: 7, kind: input, shape index: {}]   ;;  %s1944_s8 = inlined_call_operand.vmem [shape: f32[1,128], index: 8, kind: input, shape index: {}]   ;;  %s1945_s9 = inlined_call_operand.<no memory space> [shape: f32[1,1], index: 9, kind: input, shape index: {}]   ;;  %s1946_s10 = inlined_call_operand.vmem [shape: f32[2,16,128], index: 10, kind: output, shape index: {}]  }
   0x1   :  { %15 = sst [smem:[#allocation4]] %s1945_s9 }
   0x2 LB: > { %s1239_s16 = sadd.s32 4294967295, %s1604_s15   ;;  %p1243_p0 = scmp.ge.s32.totalorder %s1604_s15, 1  ;;  %s1604_s15 = sphi %s1666_s15, %s21_s15  }
   0x3   : > { %p313_p1 = scmp.lt.s32.totalorder %s1604_s15, 3 }
   0x5   : > { %p314_p2 = pnand %p1243_p0, %p313_p1 }
   0x6   : > { %p351_p3 = scmp.lt.s32.totalorder (!%p314_p2), %s1239_s16, 1  ;;  %s362_s21 = sld [smem:[#allocation4]] (!%p314_p2) }
   0x7   : > { %317 = sbr.rel (%p314_p2) target bundleno = 694 (0x2b6), region = 60 }
   0xc   : > { %v1550_v0 = vld [vmem:[%s1937_s1 + $0x38] sm:$0xff]   ;;  %v1606_v1 = vmov 0.0   ;;  %v1552_v3 = vld [vmem:[%s1937_s1 + $0x30] sm:$0xff]   ;;  %vm1607_vm0 = vmmov 0   ;;  %s1948_s16 = smov (!%p351_p3, %s1239_s16), 1  ;;  %vm368_vm1 = vcmask 523264   ;;  %v1824_v52 = vstv %s362_s21 }
   0xd   : > { %1412 = vmatprep.subr.bf16.mxu0 %v1606_v1  ;;  %628 = vst [vmem:[#allocation3] sm:$0x1] %v1606_v1  ;;  %629 = vst [vmem:[#allocation3 + $0x11] sm:$0x1] %v1606_v1  ;;  %1424 = vmatprep.subr.bf16.mxu1 %v1606_v1  ;;  %v1551_v2 = vld [vmem:[%s1937_s1 + $0x18] sm:$0xff]   ;;  %v1553_v4 = vld [vmem:[%s1937_s1 + $0x10] sm:$0xff]  }
   0xe   : > { %1413 = vmatpush3.bf16.msra.mxu0 %v1550_v0  ;;  %1420 = vmatprep.mubr.msk.bf16.mxu0 %vm1607_vm0, %v1606_v1  ;;  %vm363_vm2 = vcmask 516096   ;;  %v1554_v5 = vld [vmem:[%s1937_s1 + $0x28] sm:$0xff]   ;;  %s1354_s26 = sshll.u32 %s1948_s16, 4  ;;  %v1556_v9 = vld [vmem:[%s1937_s1 + $0x20] sm:$0xff]   ;;  %v1558_v11 = vld [vmem:[%s1937_s1 + $0x58] sm:$0xff]  }
   0xf   : > { %1425 = vmatpush3.bf16.msra.mxu1 %v1551_v2  ;;  %1414 = vmatprep.subr.bf16.mxu0 %v1606_v1  ;;  %364 = vst.msk [vmem:[#allocation2] sm:$0x1] %vm363_vm2, %v1606_v1  ;;  %365 = vst.msk [vmem:[#allocation2 + $0x11] sm:$0x1] %vm363_vm2, %v1606_v1  ;;  %v1555_v6 = vld [vmem:[%s1937_s1 + $0x8] sm:$0xff]   ;;  %s355_s11 = scalar_lea.vmem %s1936_s0, %s1354_s26  ;;  %v1557_v10 = vld [vmem:[%s1937_s1] sm:$0xff]   ;;  %s360_s9 = scalar_lea.vmem %s1946_s10, %s1354_s26 }
  0x10   : > { %1426 = vmatprep.subr.bf16.mxu1 %v1606_v1  ;;  %1432 = vmatprep.mubr.msk.bf16.mxu1 %vm1607_vm0, %v1606_v1  ;;  %v1714_v7 = vld [vmem:[%s355_s11] sm:$0xff]  ;;  %v1716_v8 = vld [vmem:[%s355_s11 + $0x8] sm:$0xff]  ;;  %v1559_v18 = vld [vmem:[%s1937_s1 + $0x50] sm:$0xff]  }
  0x11   : > { %369 = vst.msk [vmem:[#allocation2 + $0x1] sm:$0xff] %vm368_vm1, %v1714_v7  ;;  %370 = vst.msk [vmem:[#allocation2 + $0x9] sm:$0xff] %vm368_vm1, %v1716_v8  ;;  %v1560_v19 = vld [vmem:[%s1937_s1 + $0x48] sm:$0xff]   ;;  %v1561_v20 = vld [vmem:[%s1937_s1 + $0x40] sm:$0xff]  }
  0x12   : > { %1415 = vmatpush3.bf16.msra.mxu0 %v1552_v3  ;;  %v1562_v24 = vld [vmem:[%s1939_s3 + $0x78] sm:$0xff]   ;;  %v1564_v25 = vld [vmem:[%s1939_s3 + $0x70] sm:$0xff]   ;;  %v1566_v26 = vld [vmem:[%s1939_s3 + $0x68] sm:$0xff]  }
  0x13   : > { %1427 = vmatpush3.bf16.msra.mxu1 %v1553_v4  ;;  %1416 = vmatprep.subr.bf16.mxu0 %v1606_v1  ;;  %v1563_v27 = vld [vmem:[%s1939_s3 + $0x38] sm:$0xff]   ;;  %v1565_v28 = vld [vmem:[%s1939_s3 + $0x30] sm:$0xff]   ;;  %v1568_v29 = vld [vmem:[%s1939_s3 + $0x60] sm:$0xff]  }
  0x14   : > { %1428 = vmatprep.subr.bf16.mxu1 %v1606_v1  ;;  %v1567_v30 = vld [vmem:[%s1939_s3 + $0x28] sm:$0xff]   ;;  %v1570_v31 = vld [vmem:[%s1939_s3 + $0x58] sm:$0xff]   ;;  %v1572_v32 = vld [vmem:[%s1939_s3 + $0x50] sm:$0xff]  }
  0x15   : > { %v1569_v33 = vld [vmem:[%s1939_s3 + $0x20] sm:$0xff]   ;;  %v1574_v34 = vld [vmem:[%s1939_s3 + $0x48] sm:$0xff]   ;;  %v1571_v35 = vld [vmem:[%s1939_s3 + $0x18] sm:$0xff]  }
  0x16   : > { %1417 = vmatpush3.bf16.msra.mxu0 %v1554_v5  ;;  %v1576_v36 = vld [vmem:[%s1939_s3 + $0x40] sm:$0xff]   ;;  %v1573_v37 = vld [vmem:[%s1939_s3 + $0x10] sm:$0xff]   ;;  %v1575_v38 = vld [vmem:[%s1939_s3 + $0x8] sm:$0xff]  }
  0x17   : > { %1429 = vmatpush3.bf16.msra.mxu1 %v1555_v6  ;;  %1418 = vmatprep.subr.bf16.mxu0 %v1606_v1  ;;  %v1577_v39 = vld [vmem:[%s1939_s3] sm:$0xff]   ;;  %v1578_v0 = vld [vmem:[%s1939_s3 + $0xb8] sm:$0xff]   ;;  %v1579_v3 = vld [vmem:[%s1939_s3 + $0xb0] sm:$0xff]  }
  0x18   : > { %1430 = vmatprep.subr.bf16.mxu1 %v1606_v1  ;;  %v382_v12 = vld [vmem:[#allocation2 + $0x1] sm:$0xff]  ;;  %v383_v13 = vld [vmem:[#allocation2 + $0x9] sm:$0xff]  ;;  %v1279_v50 = vld [vmem:[%s1938_s2] ss:$0 sm:$0xff] }
  0x19   : > { %v371_v14 = vld [vmem:[#allocation2] sm:$0xff]  ;;  %v384_v15 = vpack.c.bf16 %v383_v13, %v382_v12  ;;  %v372_v16 = vld [vmem:[#allocation2 + $0x8] sm:$0xff]  ;;  %v1583_v12 = vld [vmem:[%s1939_s3 + $0x90] sm:$0xff]  }
  0x1a   : > { %1419 = vmatpush3.bf16.msra.mxu0 %v1556_v9  ;;  %v373_v17 = vpack.c.bf16 %v372_v16, %v371_v14  ;;  %v530_v21 = vld [vmem:[#allocation2 + $0x2] sm:$0xff]  ;;  %v531_v22 = vld [vmem:[#allocation2 + $0xa] sm:$0xff] }
  0x1b   : > { %1431 = vmatpush3.bf16.msra.mxu1 %v1557_v10  ;;  %1436 = vmatprep.subr.bf16.mxu0 %v1606_v1  ;;  %v532_v23 = vpack.c.bf16 %v531_v22, %v530_v21  ;;  %v1580_v6 = vld [vmem:[%s1939_s3 + $0xa8] sm:$0xff]   ;;  %v1581_v10 = vld [vmem:[%s1939_s3 + $0xa0] sm:$0xff]   ;;  %v1591_v21 = vld [vmem:[%s1943_s7 + $0x10] sm:$0xff]  }
  0x1c   : > { %1448 = vmatprep.subr.bf16.mxu1 %v1606_v1  ;;  %v1584_v13 = vld [vmem:[%s1939_s3 + $0x88] sm:$0xff]   ;;  %v1585_v14 = vld [vmem:[%s1939_s3 + $0x80] sm:$0xff]  }
  0x1d   : > { %1421 = vmatmul.mubr.msk.bf16.vlgmr.msra.gmra.mxu0 %vm368_vm1, %v384_v15  ;;  %v1588_v22 = vld [vmem:[%s1941_s5 + $0x28] sm:$0xff]  }
  0x1e   : > { %1433 = vmatmul.mubr.msk.bf16.vlgmr.msra.gmra.mxu1 %vm368_vm1, %v373_v17  ;;  %1437 = vmatpush3.bf16.msra.mxu0 %v1558_v11  ;;  %v1582_v11 = vld [vmem:[%s1939_s3 + $0x98] sm:$0xff]  }
  0x1f   : > { %1438 = vmatprep.subr.bf16.mxu0 %v1606_v1  ;;  %1444 = vmatprep.mubr.msk.bf16.mxu0 %vm1607_vm0, %v1606_v1 }
  0x20   : > { %1464 = vmatprep.mubr.msk.bf16.mxu1 %vm1607_vm0, %v1606_v1  ;;  %1449 = vmatpush3.bf16.msra.mxu1 %v1562_v24  ;;  %v1592_v24 = vld [vmem:[%s1941_s5 + $0x18] sm:$0xff]  }
  0x21   : > { %1450 = vmatprep.subr.bf16.mxu1 %v1606_v1 }
  0x22   : > { %1439 = vmatpush3.bf16.msra.mxu0 %v1559_v18  ;;  %v1586_v18 = vld [vmem:[%s1941_s5 + $0x38] sm:$0xff]  }
  0x23   : > { %1440 = vmatprep.subr.bf16.mxu0 %v1606_v1 }
  0x24   : > { %1451 = vmatpush3.bf16.msra.mxu1 %v1564_v25  ;;  %v1593_v25 = vld [vmem:[%s1943_s7 + $0x8] sm:$0xff]  }
  0x25   : > { %1452 = vmatprep.subr.bf16.mxu1 %v1606_v1 }
  0x26   : > { %1441 = vmatpush3.bf16.msra.mxu0 %v1560_v19  ;;  %v1589_v19 = vld [vmem:[%s1943_s7 + $0x18] sm:$0xff]  }
  0x27   : > { %1442 = vmatprep.subr.bf16.mxu0 %v1606_v1 }
  0x28   : > { %1453 = vmatpush3.bf16.msra.mxu1 %v1566_v26  ;;  %v1594_v26 = vld [vmem:[%s1941_s5 + $0x10] sm:$0xff]  }
  0x29   : > { %1454 = vmatprep.subr.bf16.mxu1 %v1606_v1 }
  0x2a   : > { %1443 = vmatpush3.bf16.msra.mxu0 %v1561_v20  ;;  %v1587_v20 = vld [vmem:[%s1941_s5 + $0x30] sm:$0xff]  }
  0x2b   : > { %1468 = vmatprep.subr.bf16.mxu0 %v1606_v1 }
  0x2c   : > { %1455 = vmatpush3.bf16.msra.mxu1 %v1568_v29  ;;  %v1090_v29 = vpack.c.bf16 %v1716_v8, %v1714_v7  ;;  %v1336_v8 = vld [vmem:[%s1940_s4] ss:$0 sm:$0xff] }
  0x2d   : > { %1445 = vmatmul.mubr.msk.bf16.vlgmr.msra.gmra.mxu0 %vm368_vm1, %v532_v23  ;;  %1456 = vmatprep.subr.bf16.mxu1 %v1606_v1  ;;  %v1590_v23 = vld [vmem:[%s1941_s5 + $0x20] sm:$0xff]  }
  0x2e   : > { %1484 = vmatprep.mubr.msk.bf16.mxu0 %vm1607_vm0, %v1606_v1  ;;  %1469 = vmatpush3.bf16.msra.mxu0 %v1563_v27  ;;  %v1595_v27 = vld [vmem:[%s1943_s7] sm:$0xff]  }
  0x2f   : > { %1470 = vmatprep.subr.bf16.mxu0 %v1606_v1 }
  0x30   : > { %1457 = vmatpush3.bf16.msra.mxu1 %v1570_v31 }
  0x31   : > { %1458 = vmatprep.subr.bf16.mxu1 %v1606_v1 }
  0x32   : > { %1471 = vmatpush3.bf16.msra.mxu0 %v1565_v28  ;;  %v1596_v28 = vld [vmem:[%s1941_s5 + $0x8] sm:$0xff]  }
  0x33   : > { %1472 = vmatprep.subr.bf16.mxu0 %v1606_v1 }
  0x34   : > { %1459 = vmatpush3.bf16.msra.mxu1 %v1572_v32 }
  0x35   : > { %1460 = vmatprep.subr.bf16.mxu1 %v1606_v1 }
  0x36   : > { %1473 = vmatpush3.bf16.msra.mxu0 %v1567_v30  ;;  %v1597_v30 = vld [vmem:[%s1941_s5] sm:$0xff]  }
  0x37   : > { %1474 = vmatprep.subr.bf16.mxu0 %v1606_v1 }
  0x38   : > { %1461 = vmatpush3.bf16.msra.mxu1 %v1574_v34 }
  0x39   : > { %1462 = vmatprep.subr.bf16.mxu1 %v1606_v1 }
  0x3a   : > { %1475 = vmatpush3.bf16.msra.mxu0 %v1569_v33 }
  0x3b   : > { %1476 = vmatprep.subr.bf16.mxu0 %v1606_v1 }
  0x3c   : > { %1463 = vmatpush3.bf16.msra.mxu1 %v1576_v36 }
  0x3d   : > { %1488 = vmatprep.subr.bf16.mxu1 %v1606_v1 }
  0x3e   : > { %1477 = vmatpush3.bf16.msra.mxu0 %v1571_v35 }
  0x3f   : > { %1478 = vmatprep.subr.bf16.mxu0 %v1606_v1 }
  0x42   : > { %1479 = vmatpush3.bf16.msra.mxu0 %v1573_v37 }
  0x43   : > { %1480 = vmatprep.subr.bf16.mxu0 %v1606_v1 }
  0x46   : > { %1481 = vmatpush3.bf16.msra.mxu0 %v1575_v38 }
  0x47   : > { %1482 = vmatprep.subr.bf16.mxu0 %v1606_v1 }
  0x4a   : > { %1483 = vmatpush3.bf16.msra.mxu0 %v1577_v39 }
  0x4b   : > { %1508 = vmatprep.subr.bf16.mxu0 %v1606_v1 }
  0xdd   : > { %v455_v40 = vpop.f32.mrf.mxu0 }
  0xde   : > { %v523_v41 = vpop.f32.mrf.mxu1 }
  0xdf   : > { %v1422_v42 = vpop.f32.mrf.mxu0  ;;  %v524_v48 = vadd.f32 %v523_v41, %v455_v40 }
  0xe0   : > { %v1434_v43 = vpop.f32.mrf.mxu1 }
  0xe1   : > { %v458_v44 = vpop.f32.mrf.mxu0 }
  0xe2   : > { %v526_v45 = vpop.f32.mrf.mxu1 }
  0xe3   : > { %v1423_v46 = vpop.f32.mrf.mxu0  ;;  %v527_v54 = vadd.f32 %v526_v45, %v458_v44 }
  0xe4   : > { %v1435_v47 = vpop.f32.mrf.mxu1 }
  0xed   : > { %v603_v49 = vpop.f32.mrf.mxu0 }
  0xee   : > { %v610_v51 = vadd.f32 %v603_v49, %v524_v48 }
  0xef   : > { %v1446_v53 = vpop.f32.mrf.mxu0 }
  0xf0   : > { %v619_v55 = vadd.f32 %v1279_v50, %v610_v51 }
  0xf1   : > { %v606_v56 = vpop.f32.mrf.mxu0 }
  0xf2   : > { %vm621_vm3 = vcmp.ge.f32.partialorder %v619_v55, 0.0  ;;  %v624_v57 = vmul.f32 %v1824_v52, %v619_v55  ;;  %v611_v58 = vadd.f32 %v606_v56, %v527_v54 }
  0xf3   : > { %v1447_v59 = vpop.f32.mrf.mxu0 }
  0xf4   : > { %v626_v60 = vsel %vm621_vm3, %v619_v55, %v624_v57  ;;  %v620_v61 = vadd.f32 %v1279_v50, %v611_v58  ;;  %v1346_v57 = vld [vmem:[%s1944_s8] ss:$0 sm:$0xff] }
  0xf5   : > { %630 = vst [vmem:[#allocation3 + $0x1] sm:$0xff] %v626_v60  ;;  %v1337_v58 = vld [vmem:[%s1942_s6] ss:$0 sm:$0xff] }
  0xf6   : > { %vm622_vm4 = vcmp.ge.f32.partialorder %v620_v61, 0.0  ;;  %v625_v62 = vmul.f32 %v1824_v52, %v620_v61 }
  0xf8   : > { %v627_v63 = vsel %vm622_vm4, %v620_v61, %v625_v62 }
  0xf9   : > { %631 = vst [vmem:[#allocation3 + $0x9] sm:$0xff] %v627_v63  ;;  %v653_v2 = vpack.c.bf16 %v627_v63, %v626_v60 }
  0xfb   : > { %1465 = vmatmul.mubr.bf16.vlgmr.msra.gmra.mxu1 %v653_v2 }
  0xfc   : > { %1489 = vmatpush3.bf16.msra.mxu1 %v1578_v0  ;;  %1504 = vmatprep.mubr.msk.bf16.mxu1 %vm1607_vm0, %v1606_v1  ;;  %v632_v4 = vld [vmem:[#allocation3] sm:$0xff] }
  0xfd   : > { %1490 = vmatprep.subr.bf16.mxu1 %v1606_v1 }
 0x100   : > { %v633_v5 = vld [vmem:[#allocation3 + $0x8] sm:$0xff]  ;;  %1491 = vmatpush3.bf16.msra.mxu1 %v1579_v3 }
 0x101   : > { %v634_v9 = vpack.c.bf16 %v633_v5, %v632_v4  ;;  %1492 = vmatprep.subr.bf16.mxu1 %v1606_v1  ;;  %v849_v15 = vld [vmem:[#allocation3 + $0x2] sm:$0xff]  ;;  %v850_v16 = vld [vmem:[#allocation3 + $0xa] sm:$0xff] }
 0x102   : > { %v851_v17 = vpack.c.bf16 %v850_v16, %v849_v15 }
 0x103   : > { %1485 = vmatmul.mubr.bf16.vlgmr.msra.gmra.mxu0 %v634_v9 }
 0x104   : > { %1493 = vmatpush3.bf16.msra.mxu1 %v1580_v6  ;;  %1524 = vmatprep.mubr.msk.bf16.mxu0 %vm1607_vm0, %v1606_v1 }
 0x105   : > { %1494 = vmatprep.subr.bf16.mxu1 %v1606_v1  ;;  %1509 = vmatpush3.bf16.msra.mxu0 %v1586_v18 }
 0x106   : > { %1510 = vmatprep.subr.bf16.mxu0 %v1606_v1 }
 0x108   : > { %1495 = vmatpush3.bf16.msra.mxu1 %v1581_v10 }
 0x109   : > { %1496 = vmatprep.subr.bf16.mxu1 %v1606_v1  ;;  %1511 = vmatpush3.bf16.msra.mxu0 %v1587_v20 }
 0x10a   : > { %1512 = vmatprep.subr.bf16.mxu0 %v1606_v1 }
 0x10c   : > { %1497 = vmatpush3.bf16.msra.mxu1 %v1582_v11 }
 0x10d   : > { %1498 = vmatprep.subr.bf16.mxu1 %v1606_v1  ;;  %1513 = vmatpush3.bf16.msra.mxu0 %v1588_v22 }
 0x10e   : > { %1514 = vmatprep.subr.bf16.mxu0 %v1606_v1 }
 0x110   : > { %1499 = vmatpush3.bf16.msra.mxu1 %v1583_v12 }
 0x111   : > { %1500 = vmatprep.subr.bf16.mxu1 %v1606_v1  ;;  %1515 = vmatpush3.bf16.msra.mxu0 %v1590_v23 }
 0x112   : > { %1516 = vmatprep.subr.bf16.mxu0 %v1606_v1 }
 0x114   : > { %1501 = vmatpush3.bf16.msra.mxu1 %v1584_v13 }
 0x115   : > { %1502 = vmatprep.subr.bf16.mxu1 %v1606_v1  ;;  %1517 = vmatpush3.bf16.msra.mxu0 %v1592_v24 }
 0x116   : > { %1518 = vmatprep.subr.bf16.mxu0 %v1606_v1 }
 0x118   : > { %1503 = vmatpush3.bf16.msra.mxu1 %v1585_v14 }
 0x119   : > { %1528 = vmatprep.subr.bf16.mxu1 %v1606_v1  ;;  %1519 = vmatpush3.bf16.msra.mxu0 %v1594_v26 }
 0x11a   : > { %1520 = vmatprep.subr.bf16.mxu0 %v1606_v1 }
 0x11b   : > { %1505 = vmatmul.mubr.bf16.vlgmr.msra.gmra.mxu1 %v851_v17 }
 0x11c   : > { %1536 = vmatprep.mubr.msk.bf16.mxu1 %vm1607_vm0, %v1606_v1  ;;  %1529 = vmatpush3.bf16.msra.mxu1 %v1589_v19 }
 0x11d   : > { %1530 = vmatprep.subr.bf16.mxu1 %v1606_v1  ;;  %1521 = vmatpush3.bf16.msra.mxu0 %v1596_v28 }
 0x11e   : > { %1522 = vmatprep.subr.bf16.mxu0 %v1606_v1 }
 0x120   : > { %1531 = vmatpush3.bf16.msra.mxu1 %v1591_v21 }
 0x121   : > { %1532 = vmatprep.subr.bf16.mxu1 %v1606_v1  ;;  %1523 = vmatpush3.bf16.msra.mxu0 %v1597_v30 }
 0x124   : > { %1533 = vmatpush3.bf16.msra.mxu1 %v1593_v25 }
 0x125   : > { %1534 = vmatprep.subr.bf16.mxu1 %v1606_v1 }
 0x128   : > { %1535 = vmatpush3.bf16.msra.mxu1 %v1595_v27 }
 0x12b   : > { %1537 = vmatmul.mubr.msk.bf16.vlgmr.msra.gmra.mxu1 %vm368_vm1, %v1090_v29 }
 0x1bb   : > { %v753_v31 = vpop.f32.mrf.mxu1 }
 0x1bd   : > { %v1466_v32 = vpop.f32.mrf.mxu1 }
 0x1bf   : > { %v756_v33 = vpop.f32.mrf.mxu1 }
 0x1c1   : > { %v1467_v34 = vpop.f32.mrf.mxu1 }
 0x1c3   : > { %v842_v35 = vpop.f32.mrf.mxu0 }
 0x1c4   : > { %v843_v39 = vadd.f32 %v842_v35, %v753_v31 }
 0x1c5   : > { %v1486_v36 = vpop.f32.mrf.mxu0 }
 0x1c7   : > { %v845_v37 = vpop.f32.mrf.mxu0 }
 0x1c8   : > { %v846_v41 = vadd.f32 %v845_v37, %v756_v33 }
 0x1c9   : > { %v1487_v38 = vpop.f32.mrf.mxu0 }
 0x1db   : > { %v951_v7 = vpop.f32.mrf.mxu1 }
 0x1dc   : > { %v958_v1 = vadd.f32 %v951_v7, %v843_v39 }
 0x1dd   : > { %v1506_v40 = vpop.f32.mrf.mxu1 }
 0x1de   : > { %v967_v42 = vadd.f32 %v1336_v8, %v958_v1 }
 0x1df   : > { %v954_v43 = vpop.f32.mrf.mxu1 }
 0x1e0   : > { %v959_v44 = vadd.f32 %v954_v43, %v846_v41  ;;  %v971_v46 = vmul.f32 %v967_v42, %v1824_v52  ;;  %vm969_vm5 = vcmp.ge.f32.partialorder %v967_v42, 0.0 }
 0x1e1   : > { %v1507_v45 = vpop.f32.mrf.mxu1 }
 0x1e2   : > { %v968_v47 = vadd.f32 %v1336_v8, %v959_v44  ;;  %v973_v49 = vsel %vm969_vm5, %v967_v42, %v971_v46 }
 0x1e4   : > { %vm970_vm6 = vcmp.ge.f32.partialorder %v968_v47, 0.0  ;;  %v972_v48 = vmul.f32 %v968_v47, %v1824_v52 }
 0x1e6   : > { %v974_v50 = vsel %vm970_vm6, %v968_v47, %v972_v48 }
 0x1e7   : > { %v975_v51 = vpack.c.bf16 %v974_v50, %v973_v49 }
 0x1e9   : > { %1525 = vmatmul.mubr.bf16.vlgmr.msra.gmra.mxu0 %v975_v51 }
 0x1eb   : > { %v1167_v53 = vpop.f32.mrf.mxu1 }
 0x1ec   : > { %v1168_v59 = vadd.f32 %v1346_v57, %v1167_v53 }
 0x1ed   : > { %v1538_v54 = vpop.f32.mrf.mxu1 }
 0x1ef   : > { %v1170_v55 = vpop.f32.mrf.mxu1 }
 0x1f0   : > { %v1171_v2 = vadd.f32 %v1346_v57, %v1170_v55 }
 0x1f1   : > { %v1539_v56 = vpop.f32.mrf.mxu1 }
 0x2a9   : > { %v1081_v60 = vpop.f32.mrf.mxu0 }
 0x2aa   : > { %v1082_v61 = vadd.f32 %v1337_v58, %v1081_v60 }
 0x2ab   : > { %v1526_v62 = vpop.f32.mrf.mxu0 }
 0x2ac   : > { %v1174_v63 = vadd.f32 %v1168_v59, %v1082_v61 }
 0x2ad   : > { %v1084_v0 = vpop.f32.mrf.mxu0 }
 0x2ae   : > { %vm1176_vm7 = vcmp.ge.f32.partialorder %v1174_v63, 0.0  ;;  %v1178_v3 = vmul.f32 %v1174_v63, %v1824_v52  ;;  %v1085_v4 = vadd.f32 %v1337_v58, %v1084_v0 }
 0x2af   : > { %v1527_v5 = vpop.f32.mrf.mxu0 }
 0x2b0   : > { %v1180_v6 = vsel %vm1176_vm7, %v1174_v63, %v1178_v3  ;;  %v1175_v9 = vadd.f32 %v1171_v2, %v1085_v4 }
 0x2b1   : > { %1182 = vst [vmem:[%s360_s9] sm:$0xff] %v1180_v6 }
 0x2b2   : > { %vm1177_vm8 = vcmp.ge.f32.partialorder %v1175_v9, 0.0  ;;  %v1179_v10 = vmul.f32 %v1175_v9, %v1824_v52 }
 0x2b4   : > { %v1181_v11 = vsel %vm1177_vm8, %v1175_v9, %v1179_v10 }
 0x2b5   : > { %1183 = vst [vmem:[%s360_s9 + $0x8] sm:$0xff] %v1181_v11 }
 0x2b6 PF: > { %s21_s15 = sadd.s32 1, %s1604_s15  }
 0x2b7   : > { %p18_p4 = scmp.ge.s32.totalorder %s21_s15, 4  }
 0x2b9   :  { %20 = sbr.rel (!%p18_p4) target bundleno = 2 (0x2), region = 94 }

</bundles_post_ra>
